<compile_context>
chip_gen: v7x
topology: tpu7x:2x2x1
jax: 0.10.0
libtpu: 0.0.40
codegen_flags: <defaults>
</compile_context>

<pallas_src>
import jax
import jax.numpy as jnp
from jax.experimental import pallas as pl
from jax.experimental.pallas import tpu as pltpu

# ----------------------------- config (synthetic) -----------------------------
NUM_ROIS = 8                  # N
INPUT_SIZE = 32               # C  (cls_score input size == MLP hidden size)
POOLER_RES = 4                # hard-coded pooler_resolution=4 in the module
H = W = POOLER_RES
HW = H * W
NUM_CLASSES = 7               # foreground classes -> scores dim = NUM_CLASSES + 1
BBOX_POINTS_NUM = 4
SEG_POINTS_NUM = 8
KEYPOINT_POINTS_NUM = 4
TOTAL_POINTS_NUM = BBOX_POINTS_NUM + SEG_POINTS_NUM + KEYPOINT_POINTS_NUM   # 16
CLS_AGNOSTIC_BBOX_REG = True
USE_RLE_LOSS = False
NUM_BBOX_REG_CLASSES = 1 if CLS_AGNOSTIC_BBOX_REG else NUM_CLASSES
NUM_POINTS_REG_CLASSES = 4 if USE_RLE_LOSS else 2

D_IN = INPUT_SIZE * HW                          # 512 == 4*128, lane-dense
D_HID = INPUT_SIZE                              # 32  (bbox_pred hidden)
D_MID = D_HID + INPUT_SIZE                      # 64  ([hidden | channel-mean])
D_DELTAS = NUM_BBOX_REG_CLASSES * TOTAL_POINTS_NUM * NUM_POINTS_REG_CLASSES   # 32
D_SCORES = NUM_CLASSES + 1                      # 8
OUT_SLAB = 128                                  # lane-dense packed output width
assert D_DELTAS + D_SCORES <= OUT_SLAB

# mask_pred / keypoint_pred are referenced in forward() but never defined in the
# reference module, so the config that makes it runnable is mask_on=keypoint_on=False.
MASK_ON = False
KEYPOINT_ON = False
# cfg.MODEL.ROI_HEADS.CLS_DROPOUT defaults off and dropout is a no-op at inference.
DO_CLS_DROPOUT = False

MAX_BLOCK_N = 256   # fills the 256x256 MXU on v6e/v7x; 2 passes of v5e's 128x128.


def _round_up(a, b):
    return (a + b - 1) // b * b


# ----------------------------- fused Pallas kernel -----------------------------
def _fused_kernel(x_ref, wa_ref, b1_ref, wb_ref, bo_ref, out_ref):
    """Fused PointsFastRCNNOutputLayers forward for one row-block.

    x_ref:   (bn, 512)  bf16  lane-dense flattened NCHW rois
    wa_ref:  (512, 64)  bf16  [w1 | mean-pool matrix]  (spatial mean folded into MXU)
    b1_ref:  (1, 64)    f32   [b1 | 0]
    wb_ref:  (64, 128)  bf16  [[w2, 0], [0, w_cls]]
    bo_ref:  (1, 128)   f32   [b2 | b_cls | 0]
    out_ref: (bn, 128)  f32   packed output slab: [proposal_deltas | scores | 0]
    """
    x = x_ref[...]
    # Stage 1 (MXU, f32 accumulate):
    #   t[:, :32] = x @ w1 + b1        (bbox_pred hidden, pre-ReLU)
    #   t[:, 32:] = per-channel spatial mean of x
    t = jnp.dot(x, wa_ref[...], preferred_element_type=jnp.float32) + b1_ref[...]
    col = jax.lax.broadcasted_iota(jnp.int32, t.shape, dimension=1)
    g = jnp.where(col < D_HID, jnp.maximum(t, 0.0), t)   # ReLU on hidden cols only (f32)
    # Stage 2: both heads accumulate into one lane-dense 128-wide slab ->
    # a single unmasked full-tile store.
    out = jnp.dot(g.astype(jnp.bfloat16), wb_ref[...],
                  preferred_element_type=jnp.float32)
    out_ref[...] = out + bo_ref[...]


def _cost_estimate(n):
    flops = 2 * n * (D_IN * D_MID + D_MID * OUT_SLAB)
    bytes_accessed = (2 * n * D_IN               # x   (bf16)
                      + 2 * D_IN * D_MID         # wa  (bf16)
                      + 4 * D_MID                # b1  (f32)
                      + 2 * D_MID * OUT_SLAB     # wb  (bf16)
                      + 4 * OUT_SLAB             # bo  (f32)
                      + 4 * n * OUT_SLAB)        # out (f32)
    return pl.CostEstimate(flops=flops, transcendentals=0,
                           bytes_accessed=bytes_accessed)


def _fused_call(x_flat, wa, b1p, wb, bo, *, block_n):
    n = x_flat.shape[0]
    assert n % block_n == 0 and block_n % 8 == 0
    grid = (n // block_n,)
    return pl.pallas_call(
        _fused_kernel,
        out_shape=jax.ShapeDtypeStruct((n, OUT_SLAB), jnp.float32),
        grid_spec=pltpu.PrefetchScalarGridSpec(
            num_scalar_prefetch=0,
            grid=grid,
            in_specs=[
                pl.BlockSpec((block_n, D_IN), lambda i: (i, 0)),   # streamed rows
                pl.BlockSpec((D_IN, D_MID), lambda i: (0, 0)),     # weights resident
                pl.BlockSpec((1, D_MID), lambda i: (0, 0)),
                pl.BlockSpec((D_MID, OUT_SLAB), lambda i: (0, 0)),
                pl.BlockSpec((1, OUT_SLAB), lambda i: (0, 0)),
            ],
            out_specs=pl.BlockSpec((block_n, OUT_SLAB), lambda i: (i, 0)),
        ),
        compiler_params=pltpu.CompilerParams(
            dimension_semantics=("parallel",),        # v7x: shard rows across 2 TCs
            vmem_limit_bytes=32 * 1024 * 1024,        # fits v7x's 64 MiB VMEM easily
        ),
        cost_estimate=_cost_estimate(n),
    )(x_flat, wa, b1p, wb, bo)


# ----------------------------- params ------------------------------------------
def init_params(key):
    """Mirrors the PyTorch __init__: cls_score.weight ~ N(0, 0.01), bias 0;
    bbox_pred Linears get small deterministic values (default init stand-in).
    Weights are stored transposed to (in, out) so y = x @ W + b."""
    k1, k2, k3, k4, k5 = jax.random.split(key, 5)
    return {
        "w_cls": 0.01 * jax.random.normal(k1, (INPUT_SIZE, D_SCORES), jnp.float32),
        "b_cls": jnp.zeros((D_SCORES,), jnp.float32),
        "w1": 0.001 * jax.random.normal(k2, (D_IN, D_HID), jnp.float32),
        "b1": 0.01 * jax.random.normal(k4, (D_HID,), jnp.float32),
        "w2": 0.001 * jax.random.normal(k3, (D_HID, D_DELTAS), jnp.float32),
        "b2": 0.01 * jax.random.normal(k5, (D_DELTAS,), jnp.float32),
    }


def pack_params(params, hw):
    """Build kernel-layout weights ONCE (bf16 matmul operands, f32 biases):
       wa = [w1 | S]      with S[c*hw + j, c] = 1/hw  -> x @ S == x.mean(H,W)
                          (matches the NCHW flatten order c*hw + j)
       wb = [[w2, 0],     rows [0:32)  -> proposal_delta cols [0:32)
             [0, w_cls]]  rows [32:64) -> score cols [32:40)
    """
    chan = jnp.arange(D_IN) // hw                                         # (512,)
    s = (chan[:, None] == jnp.arange(INPUT_SIZE)[None, :]).astype(jnp.float32) / float(hw)
    wa = jnp.concatenate([params["w1"], s], axis=1)                       # (512, 64)

    b1p = jnp.zeros((1, D_MID), jnp.float32).at[0, :D_HID].set(params["b1"])

    wb = jnp.zeros((D_MID, OUT_SLAB), jnp.float32)
    wb = wb.at[:D_HID, :D_DELTAS].set(params["w2"])
    wb = wb.at[D_HID:, D_DELTAS:D_DELTAS + D_SCORES].set(params["w_cls"])

    bo = jnp.zeros((1, OUT_SLAB), jnp.float32)
    bo = bo.at[0, :D_DELTAS].set(params["b2"])
    bo = bo.at[0, D_DELTAS:D_DELTAS + D_SCORES].set(params["b_cls"])

    return {
        "wa": wa.astype(jnp.bfloat16),
        "b1p": b1p,
        "wb": wb.astype(jnp.bfloat16),
        "bo": bo,
    }


# ----------------------------- module forward -----------------------------------
@jax.jit
def points_fast_rcnn_output_layers_forward(x, packed):
    """
    x:      (N, C, H, W) float32 (NCHW, like PyTorch)
    packed: output of pack_params
    returns (scores, proposal_deltas, seg_deltas, keypoint_deltas)
    """
    n, c, h, w = x.shape
    # bf16 cast fuses with the (free) reshape in XLA; MXU is bf16-native.
    x_flat = x.reshape(n, c * h * w).astype(jnp.bfloat16)

    block_n = min(MAX_BLOCK_N, _round_up(n, 8))
    n_pad = _round_up(n, block_n)
    if n_pad != n:
        x_flat = jnp.pad(x_flat, ((0, n_pad - n), (0, 0)))

    slab = _fused_call(x_flat, packed["wa"], packed["b1p"],
                       packed["wb"], packed["bo"], block_n=block_n)

    proposal_deltas = slab[:n, :D_DELTAS]
    scores = slab[:n, D_DELTAS:D_DELTAS + D_SCORES]
    # TODO(synk): mask_pred / keypoint_pred are used in forward() but never defined
    # in the reference module; with MASK_ON/KEYPOINT_ON False those branches are None.
    seg_deltas = None
    keypoint_deltas = None
    # TODO(synk): cls dropout (cfg.MODEL.ROI_HEADS.CLS_DROPOUT) omitted; disabled in
    # the default config and a no-op at inference.
    return scores, proposal_deltas, seg_deltas, keypoint_deltas


# ----------------------------- reference (pure JAX, f32) ------------------------
def _reference(x, params):
    n = x.shape[0]
    x_mean = x.mean(axis=(2, 3))
    x_flat = x.reshape(n, -1)
    scores = x_mean @ params["w_cls"] + params["b_cls"]
    hid = jnp.maximum(x_flat @ params["w1"] + params["b1"], 0.0)
    proposal_deltas = hid @ params["w2"] + params["b2"]
    return scores, proposal_deltas, None, None


if __name__ == "__main__":
    key = jax.random.PRNGKey(0)
    kx, kp = jax.random.split(key)

    x = jax.random.normal(kx, (NUM_ROIS, INPUT_SIZE, H, W), jnp.float32)
    params = init_params(kp)
    packed = pack_params(params, HW)

    outs = points_fast_rcnn_output_layers_forward(x, packed)
    outs = jax.block_until_ready(outs)

    refs = _reference(x, params)
    for o, r in zip(outs, refs):
        if r is None:
            assert o is None
            continue
        assert o.shape == r.shape, (o.shape, r.shape)
        # bf16 matmul operands (f32 accumulate) vs f32 reference -> loosened tol.
        assert jnp.allclose(o, r, atol=5e-3, rtol=5e-2), float(jnp.max(jnp.abs(o - r)))

    print("KERNEL_OK")
</pallas_src>

<mosaic_0001>
module attributes {stable_mosaic.version = 11 : i64} {
  func.func @_fused_kernel(%arg0: i32, %arg1: memref<8x512xbf16, #tpu.memory_space<vmem>>, %arg2: memref<512x64xbf16, #tpu.memory_space<vmem>>, %arg3: memref<1x64xf32, #tpu.memory_space<vmem>>, %arg4: memref<64x128xbf16, #tpu.memory_space<vmem>>, %arg5: memref<1x128xf32, #tpu.memory_space<vmem>>, %arg6: memref<8x128xf32, #tpu.memory_space<vmem>>) attributes {dimension_semantics = [#tpu.dimension_semantics<parallel>], iteration_bounds = array<i64: 1>, scalar_prefetch = 0 : i64, scratch_operands = 0 : i64, tpu.core_type = #tpu.core_type<tc>, window_params = [{transform_indices = @transform_0, window_bounds = array<i64: 8, 512>}, {pipeline_mode = #tpu.pipeline_mode<synchronous>, transform_indices = @transform_1, window_bounds = array<i64: 512, 64>}, {pipeline_mode = #tpu.pipeline_mode<synchronous>, transform_indices = @transform_2, window_bounds = array<i64: 1, 64>}, {pipeline_mode = #tpu.pipeline_mode<synchronous>, transform_indices = @transform_3, window_bounds = array<i64: 64, 128>}, {pipeline_mode = #tpu.pipeline_mode<synchronous>, transform_indices = @transform_4, window_bounds = array<i64: 1, 128>}, {transform_indices = @transform_5, window_bounds = array<i64: 8, 128>}]} {
    %c0 = arith.constant 0 : index
    %c0_0 = arith.constant 0 : index
    %0 = vector.load %arg1[%c0, %c0_0] : memref<8x512xbf16, #tpu.memory_space<vmem>>, vector<8x512xbf16>
    %c0_1 = arith.constant 0 : index
    %c0_2 = arith.constant 0 : index
    %1 = vector.load %arg2[%c0_1, %c0_2] : memref<512x64xbf16, #tpu.memory_space<vmem>>, vector<512x64xbf16>
    %cst = arith.constant dense<0.000000e+00> : vector<8x64xf32>
    %2 = tpu.matmul %0, %1, %cst {dimension_numbers = #tpu.dot_dimension_numbers<[1], [0], [0], [1], [0, 0, 1, 1], [], []>} : vector<8x512xbf16>, vector<512x64xbf16>, vector<8x64xf32> -> vector<8x64xf32>
    %c0_3 = arith.constant 0 : index
    %c0_4 = arith.constant 0 : index
    %3 = vector.load %arg3[%c0_3, %c0_4] : memref<1x64xf32, #tpu.memory_space<vmem>>, vector<1x64xf32>
    %4 = vector.broadcast %3 : vector<1x64xf32> to vector<8x64xf32>
    %5 = arith.addf %2, %4 : vector<8x64xf32>
    %6 = tpu.iota {dimensions = array<i32: 1>} : vector<8x64xi32>
    %c32_i32 = arith.constant 32 : i32
    %7 = vector.broadcast %c32_i32 : i32 to vector<8x64xi32>
    %8 = arith.cmpi slt, %6, %7 : vector<8x64xi32>
    %cst_5 = arith.constant 0.000000e+00 : f32
    %9 = vector.broadcast %cst_5 : f32 to vector<8x64xf32>
    %10 = arith.maximumf %5, %9 : vector<8x64xf32>
    %11 = arith.select %8, %10, %5 : vector<8x64xi1>, vector<8x64xf32>
    %12 = arith.truncf %11 : vector<8x64xf32> to vector<8x64xbf16>
    %c0_6 = arith.constant 0 : index
    %c0_7 = arith.constant 0 : index
    %13 = vector.load %arg4[%c0_6, %c0_7] : memref<64x128xbf16, #tpu.memory_space<vmem>>, vector<64x128xbf16>
    %cst_8 = arith.constant dense<0.000000e+00> : vector<8x128xf32>
    %14 = tpu.matmul %12, %13, %cst_8 {dimension_numbers = #tpu.dot_dimension_numbers<[1], [0], [0], [1], [0, 0, 1, 1], [], []>} : vector<8x64xbf16>, vector<64x128xbf16>, vector<8x128xf32> -> vector<8x128xf32>
    %c0_9 = arith.constant 0 : index
    %c0_10 = arith.constant 0 : index
    %15 = vector.load %arg5[%c0_9, %c0_10] : memref<1x128xf32, #tpu.memory_space<vmem>>, vector<1x128xf32>
    %16 = vector.broadcast %15 : vector<1x128xf32> to vector<8x128xf32>
    %17 = arith.addf %14, %16 : vector<8x128xf32>
    %c0_11 = arith.constant 0 : index
    %c0_12 = arith.constant 0 : index
    %18 = vector.load %arg6[%c0_11, %c0_12] : memref<8x128xf32, #tpu.memory_space<vmem>>, vector<8x128xf32>
    tpu.vector_store %arg6[%c0_11, %c0_12], %17 {strides = array<i32>} : memref<8x128xf32, #tpu.memory_space<vmem>>, vector<8x128xf32>,
    return
  }
  func.func @transform_0(%arg0: i32) -> (i32, i32) {
    %c0_i32 = arith.constant 0 : i32
    %c0_i32_0 = arith.constant 0 : i32
    return %arg0, %c0_i32 : i32, i32
  }
  func.func @transform_1(%arg0: i32) -> (i32, i32) {
    %c0_i32 = arith.constant 0 : i32
    %c0_i32_0 = arith.constant 0 : i32
    %c0_i32_1 = arith.constant 0 : i32
    return %c0_i32, %c0_i32_0 : i32, i32
  }
  func.func @transform_2(%arg0: i32) -> (i32, i32) {
    %c0_i32 = arith.constant 0 : i32
    %c0_i32_0 = arith.constant 0 : i32
    %c0_i32_1 = arith.constant 0 : i32
    return %c0_i32, %c0_i32_0 : i32, i32
  }
  func.func @transform_3(%arg0: i32) -> (i32, i32) {
    %c0_i32 = arith.constant 0 : i32
    %c0_i32_0 = arith.constant 0 : i32
    %c0_i32_1 = arith.constant 0 : i32
    return %c0_i32, %c0_i32_0 : i32, i32
  }
  func.func @transform_4(%arg0: i32) -> (i32, i32) {
    %c0_i32 = arith.constant 0 : i32
    %c0_i32_0 = arith.constant 0 : i32
    %c0_i32_1 = arith.constant 0 : i32
    return %c0_i32, %c0_i32_0 : i32, i32
  }
  func.func @transform_5(%arg0: i32) -> (i32, i32) {
    %c0_i32 = arith.constant 0 : i32
    %c0_i32_0 = arith.constant 0 : i32
    return %arg0, %c0_i32 : i32, i32
  }
}

</mosaic_0001>

<bundles_post_ra>
// kernel: points_fast_rcnn_output_layers_forward.1
= control target key start
LH: loop header
LB: loop body
LE: loop exit
PB: predicated region body
PF: predicated region fallthrough
CT: control target
= control target key end

     0   :  { %v620_v39 = vmov 0.0   ;;  %vm621_vm0 = vmmov 0   ;;  %v380_v43 = vlaneseq  ;;  %vm425_vm2 = vcmask 523264   ;;  %s775_s1 = inlined_call_operand.vmem [shape: bf16[512,64], index: 1, kind: input, shape index: {}]   ;;  %s776_s0 = inlined_call_operand.vmem [shape: bf16[8,512], index: 0, kind: input, shape index: {}]   ;;  %s777_s3 = inlined_call_operand.vmem [shape: bf16[64,128], index: 3, kind: input, shape index: {}]   ;;  %s778_s2 = inlined_call_operand.vmem [shape: f32[1,64], index: 2, kind: input, shape index: {}]   ;;  %s779_s4 = inlined_call_operand.vmem [shape: f32[1,128], index: 4, kind: input, shape index: {}]   ;;  %s780_s5 = inlined_call_operand.vmem [shape: f32[8,128], index: 5, kind: output, shape index: {}]  }
   0x1   :  { %v580_v0 = vld [vmem:[%s775_s1 + $0x40] sm:$0xff]   ;;  %v584_v4 = vld [vmem:[%s775_s1 + $0x48] sm:$0xff]   ;;  %v588_v8 = vld [vmem:[%s775_s1 + $0x50] sm:$0xff]  }
   0x2   :  { %v581_v1 = vld [vmem:[%s775_s1 + $0xc0] sm:$0xff]   ;;  %517 = vmatprep.subr.bf16.mxu0 %v580_v0  ;;  %v585_v5 = vld [vmem:[%s775_s1 + $0xc8] sm:$0xff]   ;;  %v589_v9 = vld [vmem:[%s775_s1 + $0xd0] sm:$0xff]   ;;  %v381_v53 = vand.u32 127, %v380_v43 }
   0x3   :  { %v582_v2 = vld [vmem:[%s775_s1] sm:$0xff]   ;;  %539 = vmatprep.subr.bf16.mxu1 %v581_v1  ;;  %v586_v6 = vld [vmem:[%s775_s1 + $0x8] sm:$0xff]   ;;  %v590_v10 = vld [vmem:[%s775_s1 + $0x10] sm:$0xff]  }
   0x4   :  { %v583_v3 = vld [vmem:[%s775_s1 + $0x80] sm:$0xff]   ;;  %518 = vmatpush3.bf16.msra.mxu0 %v582_v2  ;;  %v587_v7 = vld [vmem:[%s775_s1 + $0x88] sm:$0xff]   ;;  %v591_v11 = vld [vmem:[%s775_s1 + $0x90] sm:$0xff]   ;;  %vm382_vm1 = vcmp.lt.s32.totalorder %v381_v53, 32 }
   0x5   :  { %540 = vmatpush3.bf16.msra.mxu1 %v583_v3  ;;  %519 = vmatprep.subr.bf16.mxu0 %v584_v4  ;;  %v592_v12 = vld [vmem:[%s775_s1 + $0x58] sm:$0xff]   ;;  %v596_v16 = vld [vmem:[%s775_s1 + $0x60] sm:$0xff]   ;;  %v600_v20 = vld [vmem:[%s775_s1 + $0x68] sm:$0xff]  }
   0x6   :  { %541 = vmatprep.subr.bf16.mxu1 %v585_v5  ;;  %v593_v13 = vld [vmem:[%s775_s1 + $0xd8] sm:$0xff]   ;;  %v597_v17 = vld [vmem:[%s775_s1 + $0xe0] sm:$0xff]   ;;  %v601_v21 = vld [vmem:[%s775_s1 + $0xe8] sm:$0xff]  }
   0x7   :  { %v594_v14 = vld [vmem:[%s775_s1 + $0x18] sm:$0xff]   ;;  %v598_v18 = vld [vmem:[%s775_s1 + $0x20] sm:$0xff]   ;;  %v602_v22 = vld [vmem:[%s775_s1 + $0x28] sm:$0xff]  }
   0x8   :  { %520 = vmatpush3.bf16.msra.mxu0 %v586_v6  ;;  %v595_v15 = vld [vmem:[%s775_s1 + $0x98] sm:$0xff]   ;;  %v599_v19 = vld [vmem:[%s775_s1 + $0xa0] sm:$0xff]   ;;  %v603_v23 = vld [vmem:[%s775_s1 + $0xa8] sm:$0xff]  }
   0x9   :  { %542 = vmatpush3.bf16.msra.mxu1 %v587_v7  ;;  %521 = vmatprep.subr.bf16.mxu0 %v588_v8  ;;  %v604_v24 = vld [vmem:[%s775_s1 + $0x70] sm:$0xff]   ;;  %v608_v28 = vld [vmem:[%s775_s1 + $0x78] sm:$0xff]   ;;  %v21_v32 = vld [vmem:[%s776_s0] sm:$0xff] }
   0xa   :  { %543 = vmatprep.subr.bf16.mxu1 %v589_v9  ;;  %v605_v25 = vld [vmem:[%s775_s1 + $0xf0] sm:$0xff]   ;;  %v609_v29 = vld [vmem:[%s775_s1 + $0xf8] sm:$0xff]   ;;  %v22_v33 = vld [vmem:[%s776_s0 + $0x8] sm:$0xff]  ;;  %v475_v34 = vcombine.low %v21_v32, %v21_v32  ;;  %v476_v35 = vcombine.high %v21_v32, %v21_v32 }
   0xb   :  { %v606_v26 = vld [vmem:[%s775_s1 + $0x30] sm:$0xff]   ;;  %v610_v30 = vld [vmem:[%s775_s1 + $0x38] sm:$0xff]   ;;  %v477_v36 = vcombine.low %v22_v33, %v22_v33  ;;  %v478_v37 = vcombine.high %v22_v33, %v22_v33  ;;  %v616_v38 = vld [vmem:[%s777_s3] sm:$0xff]  }
   0xc   :  { %522 = vmatpush3.bf16.msra.mxu0 %v590_v10  ;;  %v607_v27 = vld [vmem:[%s775_s1 + $0xb0] sm:$0xff]   ;;  %v611_v31 = vld [vmem:[%s775_s1 + $0xb8] sm:$0xff]   ;;  %332 = vmatprep.mubr.bf16.mxu0 %v476_v35  ;;  %v617_v40 = vld [vmem:[%s777_s3 + $0x8] sm:$0xff]  }
   0xd   :  { %544 = vmatpush3.bf16.msra.mxu1 %v591_v11  ;;  %523 = vmatprep.subr.bf16.mxu0 %v592_v12  ;;  %v618_v41 = vld [vmem:[%s777_s3 + $0x10] sm:$0xff]   ;;  %v619_v42 = vld [vmem:[%s777_s3 + $0x18] sm:$0xff]   ;;  %v474_v46 = vld [vmem:[%s778_s2] ss:$0 sm:$0xff] }
   0xe   :  { %545 = vmatprep.subr.bf16.mxu1 %v593_v13  ;;  %372 = vmatprep.mubr.bf16.mxu1 %v478_v37  ;;  %v511_v61 = vld [vmem:[%s779_s4] ss:$0 sm:$0xff] }
  0x10   :  { %524 = vmatpush3.bf16.msra.mxu0 %v594_v14 }
  0x11   :  { %546 = vmatpush3.bf16.msra.mxu1 %v595_v15  ;;  %525 = vmatprep.subr.bf16.mxu0 %v596_v16 }
  0x12   :  { %547 = vmatprep.subr.bf16.mxu1 %v597_v17 }
  0x14   :  { %526 = vmatpush3.bf16.msra.mxu0 %v598_v18 }
  0x15   :  { %548 = vmatpush3.bf16.msra.mxu1 %v599_v19  ;;  %527 = vmatprep.subr.bf16.mxu0 %v600_v20 }
  0x16   :  { %549 = vmatprep.subr.bf16.mxu1 %v601_v21 }
  0x18   :  { %528 = vmatpush3.bf16.msra.mxu0 %v602_v22 }
  0x19   :  { %550 = vmatpush3.bf16.msra.mxu1 %v603_v23  ;;  %529 = vmatprep.subr.bf16.mxu0 %v604_v24 }
  0x1a   :  { %551 = vmatprep.subr.bf16.mxu1 %v605_v25 }
  0x1c   :  { %530 = vmatpush3.bf16.msra.mxu0 %v606_v26 }
  0x1d   :  { %552 = vmatpush3.bf16.msra.mxu1 %v607_v27  ;;  %531 = vmatprep.subr.bf16.mxu0 %v608_v28 }
  0x1e   :  { %553 = vmatprep.subr.bf16.mxu1 %v609_v29 }
  0x20   :  { %532 = vmatpush3.bf16.msra.mxu0 %v610_v30 }
  0x21   :  { %554 = vmatpush3.bf16.msra.mxu1 %v611_v31  ;;  %566 = vmatprep.subr.bf16.mxu0 %v620_v39 }
  0x23   :  { %333 = vmatmul.mubr.bf16.vlgmr.msra.gmra.mrb[0].mxu0 %v475_v34 }
  0x24   :  { %373 = vmatmul.mubr.bf16.vlgmr.msra.gmra.mrb[0].mxu1 %v477_v36  ;;  %567 = vmatpush3.bf16.msra.mxu0 %v616_v38 }
  0x25   :  { %568 = vmatprep.subr.bf16.mxu0 %v620_v39  ;;  %574 = vmatprep.mubr.msk.bf16.mxu0 %vm621_vm0, %v620_v39 }
  0x28   :  { %569 = vmatpush3.bf16.msra.mxu0 %v617_v40 }
  0x29   :  { %570 = vmatprep.subr.bf16.mxu0 %v620_v39 }
  0x2c   :  { %571 = vmatpush3.bf16.msra.mxu0 %v618_v41 }
  0x2d   :  { %572 = vmatprep.subr.bf16.mxu0 %v620_v39 }
  0x30   :  { %573 = vmatpush3.bf16.msra.mxu0 %v619_v42 }
  0xf6   :  { %v533_v44 = vpop.f32.mrb[0].mxu0 }
  0xf7   :  { %v555_v45 = vpop.f32.mrb[0].mxu1  ;;  %v534_v47 = vpop.f32.mrb[1].mxu0 }
  0xf8   :  { %v556_v48 = vpop.f32.mrb[1].mxu1  ;;  %v535_v49 = vadd.f32 %v534_v47, %v533_v44  ;;  %v536_v51 = vpop.f32.mrb[2].mxu0 }
  0xf9   :  { %v557_v50 = vadd.f32 %v556_v48, %v555_v45  ;;  %v558_v52 = vpop.f32.mrb[2].mxu1  ;;  %v537_v54 = vpop.f32.mrb[3].mxu0 }
  0xfa   :  { %v559_v55 = vpop.f32.mrb[3].mxu1  ;;  %v335_v56 = vadd.f32 %v535_v49, %v474_v46 }
  0xfc   :  { %v375_v57 = vadd.f32 %v557_v50, %v335_v56 }
  0xfe   :  { %v383_v58 = vmax.f32 %v375_v57, 0.0 }
 0x100   :  { %v384_v59 = vsel %vm382_vm1, %v383_v58, %v375_v57 }
 0x101   :  { %v385_v60 = vpack.c.bf16 %v384_v59, %v384_v59 }
 0x103   :  { %575 = vmatmul.mubr.msk.bf16.vlgmr.msra.gmra.mrb[4].mxu0 %vm425_vm2, %v385_v60 }
 0x1d6   :  { %v463_v62 = vpop.f32.mrb[4].mxu0 }
 0x1d7   :  { %v464_v63 = vadd.f32 %v511_v61, %v463_v62  ;;  %v576_v0 = vpop.f32.mrb[5].mxu0 }
 0x1d8   :  { %v466_v1 = vpop.f32.mrb[6].mxu0 }
 0x1d9   :  { %469 = vst [vmem:[%s780_s5] sm:$0xff] %v464_v63  ;;  %v577_v2 = vpop.f32.mrb[7].mxu0 }

</bundles_post_ra>
